<compile_context>
chip_gen: v5e
topology: v5e:2x2
jax: 0.10.0
libtpu: 0.0.40
codegen_flags: <defaults>
</compile_context>

<pallas_src>
import jax
import jax.numpy as jnp
from jax import lax
from jax.experimental import pallas as pl
from jax.experimental.pallas import tpu as pltpu


def _make_cnn_kernel(C, k, L_out):
    KC = k * C

    def kernel(x_ref, w_ref, b_ref, o_ref, acc_ref):
        # x_ref:   (TB, L*C)    bf16  char embeddings, flattened NLC layout
        # w_ref:   (k*C, F_pad) bf16  conv weights, taps folded into the contraction dim
        # b_ref:   (1, F_pad)   f32   conv bias (zeros in padded lanes)
        # o_ref:   (TB, F_pad)  f32   word embeddings (lane-dense store; wrapper slices :F)
        # acc_ref: (TB, F_pad)  f32   VMEM scratch: running max over output positions
        xt = x_ref[...]
        w = w_ref[...]

        # Output position p == one (TB, k*C) x (k*C, F_pad) MXU pass; stream a running
        # max on the VPU instead of materializing a (TB, L_out, F_pad) accumulator.
        acc_ref[...] = jnp.dot(xt[:, 0:KC], w, preferred_element_type=jnp.float32)
        for p in range(1, L_out):                       # static, unrolled
            lhs = xt[:, p * C:p * C + KC]               # static k*C-wide lane slice
            acc_ref[...] = jnp.maximum(
                acc_ref[...],
                jnp.dot(lhs, w, preferred_element_type=jnp.float32))

        # bias + ReLU hoisted out of the reduction:
        #   max_p relu(conv_p + b) == relu(max_p conv_p + b)
        o_ref[...] = jnp.maximum(acc_ref[...] + b_ref[...], 0.0)

    return kernel


def _pick_batch_tile(B):
    if B <= 8:
        return B
    # Aim for a multi-step grid (DMA/compute overlap + v7x 2-TC sharding) with tiles
    # that are a multiple of 8 sublanes and still large enough to amortize the
    # ~0.35 us per-step overhead (capped at 512 rows).
    tile = (B // 4) // 8 * 8
    return max(8, min(512, tile if tile else 8))


def cnn_forward(x, weight, bias, *, batch_tile=None):
    """x: (B, e_char, max_word_len) NCL; weight: (f, e_char, k); bias: (f,). Returns (B, f) f32."""
    B, C, L = x.shape
    F, Cw, k = weight.shape
    assert Cw == C and k <= L
    L_out = L - k + 1
    F_pad = pl.cdiv(F, 128) * 128          # lane-dense output store (unmasked vst)

    if batch_tile is None:
        batch_tile = _pick_batch_tile(B)
    B_pad = pl.cdiv(B, batch_tile) * batch_tile

    # Wrapper layout plumbing (1x footprint; bf16 cast fused with the transpose):
    #   NCL -> NLC -> (B, L*C) so the k taps become a contiguous k*C-wide slice per position.
    # TODO(synk): have the upstream char-embedding lookup emit NLC directly to drop this transpose.
    x_flat = jnp.transpose(x, (0, 2, 1)).astype(jnp.bfloat16).reshape(B, L * C)
    if B_pad != B:
        x_flat = jnp.pad(x_flat, ((0, B_pad - B), (0, 0)))

    # weight (F, C, k) -> (k, C, F) -> (k*C, F_pad): row index t*C + c matches the NLC
    # flattening of each length-k window.
    w_flat = jnp.transpose(weight, (2, 1, 0)).reshape(k * C, F)
    w_flat = jnp.pad(w_flat, ((0, 0), (0, F_pad - F))).astype(jnp.bfloat16)
    b_pad = jnp.pad(bias.astype(jnp.float32), (0, F_pad - F)).reshape(1, F_pad)

    # Explicit scoped-VMEM budget from the lane-padded per-step footprint.
    lanes = lambda n: pl.cdiv(n, 128) * 128
    est = (2 * batch_tile * lanes(L * C) * 2                 # x tile, bf16, double-buffered
           + 2 * (pl.cdiv(k * C, 8) * 8) * F_pad * 2         # weights, bf16
           + 2 * 8 * F_pad * 4                               # bias
           + 3 * batch_tile * F_pad * 4)                     # out (double-buffered) + scratch acc
    vmem_limit = int(min(48 * 1024 * 1024, max(16 * 1024 * 1024, 2 * est)))

    grid = (B_pad // batch_tile,)
    out = pl.pallas_call(
        _make_cnn_kernel(C, k, L_out),
        out_shape=jax.ShapeDtypeStruct((B_pad, F_pad), jnp.float32),
        grid_spec=pltpu.PrefetchScalarGridSpec(
            num_scalar_prefetch=0,
            grid=grid,
            in_specs=[
                pl.BlockSpec((batch_tile, L * C), lambda i: (i, 0)),
                pl.BlockSpec((k * C, F_pad), lambda i: (0, 0)),
                pl.BlockSpec((1, F_pad), lambda i: (0, 0)),
            ],
            out_specs=pl.BlockSpec((batch_tile, F_pad), lambda i: (i, 0)),
            scratch_shapes=[pltpu.VMEM((batch_tile, F_pad), jnp.float32)],
        ),
        compiler_params=pltpu.CompilerParams(
            dimension_semantics=("parallel",),   # batch tiles are independent
            vmem_limit_bytes=vmem_limit,
        ),
    )(x_flat, w_flat, b_pad)
    return out[:B, :F]


def _reference(x, weight, bias):
    """Pure-JAX reference using lax convolution (matches PyTorch Conv1d semantics)."""
    conv = lax.conv_general_dilated(
        x, weight,
        window_strides=(1,),
        padding="VALID",
        dimension_numbers=("NCH", "OIH", "NCH"),
    ) + bias[None, :, None]
    return jnp.max(jnp.maximum(conv, 0.0), axis=-1)


if __name__ == "__main__":
    # Small, deterministic config consistent with the module's __init__.
    f = 32               # number of filters (word embedding size)
    e_char_size = 16     # char embedding size
    max_word_len = 12
    k = 5
    batch = 16

    key = jax.random.PRNGKey(0)
    kx, kw, kb = jax.random.split(key, 3)
    x = jax.random.normal(kx, (batch, e_char_size, max_word_len), dtype=jnp.float32)
    weight = jax.random.normal(kw, (f, e_char_size, k), dtype=jnp.float32) * 0.1
    bias = jax.random.normal(kb, (f,), dtype=jnp.float32) * 0.1

    out = jax.block_until_ready(cnn_forward(x, weight, bias))

    # Reference on bf16-rounded inputs (kernel matmuls are bf16 x bf16 -> f32 on the MXU).
    x_q = x.astype(jnp.bfloat16).astype(jnp.float32)
    w_q = weight.astype(jnp.bfloat16).astype(jnp.float32)
    ref = jax.block_until_ready(_reference(x_q, w_q, bias))

    assert out.shape == (batch, f)
    assert jnp.allclose(out, ref, atol=1e-2, rtol=1e-2), "mismatch vs reference"

    print("KERNEL_OK")
</pallas_src>

<mosaic_0001>
module attributes {stable_mosaic.version = 11 : i64} {
  func.func @kernel(%arg0: i32, %arg1: memref<8x192xbf16, #tpu.memory_space<vmem>>, %arg2: memref<80x128xbf16, #tpu.memory_space<vmem>>, %arg3: memref<1x128xf32, #tpu.memory_space<vmem>>, %arg4: memref<8x128xf32, #tpu.memory_space<vmem>>, %arg5: memref<8x128xf32, #tpu.memory_space<vmem>>) attributes {dimension_semantics = [#tpu.dimension_semantics<parallel>], iteration_bounds = array<i64: 2>, scalar_prefetch = 0 : i64, scratch_operands = 1 : i64, tpu.core_type = #tpu.core_type<tc>, window_params = [{transform_indices = @transform_0, window_bounds = array<i64: 8, 192>}, {pipeline_mode = #tpu.pipeline_mode<synchronous>, transform_indices = @transform_1, window_bounds = array<i64: 80, 128>}, {pipeline_mode = #tpu.pipeline_mode<synchronous>, transform_indices = @transform_2, window_bounds = array<i64: 1, 128>}, {transform_indices = @transform_3, window_bounds = array<i64: 8, 128>}]} {
    %c0 = arith.constant 0 : index
    %c0_0 = arith.constant 0 : index
    %0 = vector.load %arg1[%c0, %c0_0] : memref<8x192xbf16, #tpu.memory_space<vmem>>, vector<8x192xbf16>
    %c0_1 = arith.constant 0 : index
    %c0_2 = arith.constant 0 : index
    %1 = vector.load %arg2[%c0_1, %c0_2] : memref<80x128xbf16, #tpu.memory_space<vmem>>, vector<80x128xbf16>
    %2 = vector.extract_strided_slice %0 {offsets = [0, 0], sizes = [8, 80], strides = [1, 1]} : vector<8x192xbf16> to vector<8x80xbf16>
    %cst = arith.constant dense<0.000000e+00> : vector<8x128xf32>
    %3 = tpu.matmul %2, %1, %cst {dimension_numbers = #tpu.dot_dimension_numbers<[1], [0], [0], [1], [0, 0, 1, 1], [], []>} : vector<8x80xbf16>, vector<80x128xbf16>, vector<8x128xf32> -> vector<8x128xf32>
    %c0_3 = arith.constant 0 : index
    %c0_4 = arith.constant 0 : index
    %4 = vector.load %arg5[%c0_3, %c0_4] : memref<8x128xf32, #tpu.memory_space<vmem>>, vector<8x128xf32>
    tpu.vector_store %arg5[%c0_3, %c0_4], %3 {strides = array<i32>} : memref<8x128xf32, #tpu.memory_space<vmem>>, vector<8x128xf32>,
    %5 = vector.extract_strided_slice %0 {offsets = [0, 16], sizes = [8, 80], strides = [1, 1]} : vector<8x192xbf16> to vector<8x80xbf16>
    %c0_5 = arith.constant 0 : index
    %c0_6 = arith.constant 0 : index
    %6 = vector.load %arg5[%c0_5, %c0_6] : memref<8x128xf32, #tpu.memory_space<vmem>>, vector<8x128xf32>
    %cst_7 = arith.constant dense<0.000000e+00> : vector<8x128xf32>
    %7 = tpu.matmul %5, %1, %cst_7 {dimension_numbers = #tpu.dot_dimension_numbers<[1], [0], [0], [1], [0, 0, 1, 1], [], []>} : vector<8x80xbf16>, vector<80x128xbf16>, vector<8x128xf32> -> vector<8x128xf32>
    %8 = arith.maximumf %6, %7 : vector<8x128xf32>
    %c0_8 = arith.constant 0 : index
    %c0_9 = arith.constant 0 : index
    %9 = vector.load %arg5[%c0_8, %c0_9] : memref<8x128xf32, #tpu.memory_space<vmem>>, vector<8x128xf32>
    tpu.vector_store %arg5[%c0_8, %c0_9], %8 {strides = array<i32>} : memref<8x128xf32, #tpu.memory_space<vmem>>, vector<8x128xf32>,
    %10 = vector.extract_strided_slice %0 {offsets = [0, 32], sizes = [8, 80], strides = [1, 1]} : vector<8x192xbf16> to vector<8x80xbf16>
    %c0_10 = arith.constant 0 : index
    %c0_11 = arith.constant 0 : index
    %11 = vector.load %arg5[%c0_10, %c0_11] : memref<8x128xf32, #tpu.memory_space<vmem>>, vector<8x128xf32>
    %cst_12 = arith.constant dense<0.000000e+00> : vector<8x128xf32>
    %12 = tpu.matmul %10, %1, %cst_12 {dimension_numbers = #tpu.dot_dimension_numbers<[1], [0], [0], [1], [0, 0, 1, 1], [], []>} : vector<8x80xbf16>, vector<80x128xbf16>, vector<8x128xf32> -> vector<8x128xf32>
    %13 = arith.maximumf %11, %12 : vector<8x128xf32>
    %c0_13 = arith.constant 0 : index
    %c0_14 = arith.constant 0 : index
    %14 = vector.load %arg5[%c0_13, %c0_14] : memref<8x128xf32, #tpu.memory_space<vmem>>, vector<8x128xf32>
    tpu.vector_store %arg5[%c0_13, %c0_14], %13 {strides = array<i32>} : memref<8x128xf32, #tpu.memory_space<vmem>>, vector<8x128xf32>,
    %15 = vector.extract_strided_slice %0 {offsets = [0, 48], sizes = [8, 80], strides = [1, 1]} : vector<8x192xbf16> to vector<8x80xbf16>
    %c0_15 = arith.constant 0 : index
    %c0_16 = arith.constant 0 : index
    %16 = vector.load %arg5[%c0_15, %c0_16] : memref<8x128xf32, #tpu.memory_space<vmem>>, vector<8x128xf32>
    %cst_17 = arith.constant dense<0.000000e+00> : vector<8x128xf32>
    %17 = tpu.matmul %15, %1, %cst_17 {dimension_numbers = #tpu.dot_dimension_numbers<[1], [0], [0], [1], [0, 0, 1, 1], [], []>} : vector<8x80xbf16>, vector<80x128xbf16>, vector<8x128xf32> -> vector<8x128xf32>
    %18 = arith.maximumf %16, %17 : vector<8x128xf32>
    %c0_18 = arith.constant 0 : index
    %c0_19 = arith.constant 0 : index
    %19 = vector.load %arg5[%c0_18, %c0_19] : memref<8x128xf32, #tpu.memory_space<vmem>>, vector<8x128xf32>
    tpu.vector_store %arg5[%c0_18, %c0_19], %18 {strides = array<i32>} : memref<8x128xf32, #tpu.memory_space<vmem>>, vector<8x128xf32>,
    %20 = vector.extract_strided_slice %0 {offsets = [0, 64], sizes = [8, 80], strides = [1, 1]} : vector<8x192xbf16> to vector<8x80xbf16>
    %c0_20 = arith.constant 0 : index
    %c0_21 = arith.constant 0 : index
    %21 = vector.load %arg5[%c0_20, %c0_21] : memref<8x128xf32, #tpu.memory_space<vmem>>, vector<8x128xf32>
    %cst_22 = arith.constant dense<0.000000e+00> : vector<8x128xf32>
    %22 = tpu.matmul %20, %1, %cst_22 {dimension_numbers = #tpu.dot_dimension_numbers<[1], [0], [0], [1], [0, 0, 1, 1], [], []>} : vector<8x80xbf16>, vector<80x128xbf16>, vector<8x128xf32> -> vector<8x128xf32>
    %23 = arith.maximumf %21, %22 : vector<8x128xf32>
    %c0_23 = arith.constant 0 : index
    %c0_24 = arith.constant 0 : index
    %24 = vector.load %arg5[%c0_23, %c0_24] : memref<8x128xf32, #tpu.memory_space<vmem>>, vector<8x128xf32>
    tpu.vector_store %arg5[%c0_23, %c0_24], %23 {strides = array<i32>} : memref<8x128xf32, #tpu.memory_space<vmem>>, vector<8x128xf32>,
    %25 = vector.extract_strided_slice %0 {offsets = [0, 80], sizes = [8, 80], strides = [1, 1]} : vector<8x192xbf16> to vector<8x80xbf16>
    %c0_25 = arith.constant 0 : index
    %c0_26 = arith.constant 0 : index
    %26 = vector.load %arg5[%c0_25, %c0_26] : memref<8x128xf32, #tpu.memory_space<vmem>>, vector<8x128xf32>
    %cst_27 = arith.constant dense<0.000000e+00> : vector<8x128xf32>
    %27 = tpu.matmul %25, %1, %cst_27 {dimension_numbers = #tpu.dot_dimension_numbers<[1], [0], [0], [1], [0, 0, 1, 1], [], []>} : vector<8x80xbf16>, vector<80x128xbf16>, vector<8x128xf32> -> vector<8x128xf32>
    %28 = arith.maximumf %26, %27 : vector<8x128xf32>
    %c0_28 = arith.constant 0 : index
    %c0_29 = arith.constant 0 : index
    %29 = vector.load %arg5[%c0_28, %c0_29] : memref<8x128xf32, #tpu.memory_space<vmem>>, vector<8x128xf32>
    tpu.vector_store %arg5[%c0_28, %c0_29], %28 {strides = array<i32>} : memref<8x128xf32, #tpu.memory_space<vmem>>, vector<8x128xf32>,
    %30 = vector.extract_strided_slice %0 {offsets = [0, 96], sizes = [8, 80], strides = [1, 1]} : vector<8x192xbf16> to vector<8x80xbf16>
    %c0_30 = arith.constant 0 : index
    %c0_31 = arith.constant 0 : index
    %31 = vector.load %arg5[%c0_30, %c0_31] : memref<8x128xf32, #tpu.memory_space<vmem>>, vector<8x128xf32>
    %cst_32 = arith.constant dense<0.000000e+00> : vector<8x128xf32>
    %32 = tpu.matmul %30, %1, %cst_32 {dimension_numbers = #tpu.dot_dimension_numbers<[1], [0], [0], [1], [0, 0, 1, 1], [], []>} : vector<8x80xbf16>, vector<80x128xbf16>, vector<8x128xf32> -> vector<8x128xf32>
    %33 = arith.maximumf %31, %32 : vector<8x128xf32>
    %c0_33 = arith.constant 0 : index
    %c0_34 = arith.constant 0 : index
    %34 = vector.load %arg5[%c0_33, %c0_34] : memref<8x128xf32, #tpu.memory_space<vmem>>, vector<8x128xf32>
    tpu.vector_store %arg5[%c0_33, %c0_34], %33 {strides = array<i32>} : memref<8x128xf32, #tpu.memory_space<vmem>>, vector<8x128xf32>,
    %35 = vector.extract_strided_slice %0 {offsets = [0, 112], sizes = [8, 80], strides = [1, 1]} : vector<8x192xbf16> to vector<8x80xbf16>
    %c0_35 = arith.constant 0 : index
    %c0_36 = arith.constant 0 : index
    %36 = vector.load %arg5[%c0_35, %c0_36] : memref<8x128xf32, #tpu.memory_space<vmem>>, vector<8x128xf32>
    %cst_37 = arith.constant dense<0.000000e+00> : vector<8x128xf32>
    %37 = tpu.matmul %35, %1, %cst_37 {dimension_numbers = #tpu.dot_dimension_numbers<[1], [0], [0], [1], [0, 0, 1, 1], [], []>} : vector<8x80xbf16>, vector<80x128xbf16>, vector<8x128xf32> -> vector<8x128xf32>
    %38 = arith.maximumf %36, %37 : vector<8x128xf32>
    %c0_38 = arith.constant 0 : index
    %c0_39 = arith.constant 0 : index
    %39 = vector.load %arg5[%c0_38, %c0_39] : memref<8x128xf32, #tpu.memory_space<vmem>>, vector<8x128xf32>
    tpu.vector_store %arg5[%c0_38, %c0_39], %38 {strides = array<i32>} : memref<8x128xf32, #tpu.memory_space<vmem>>, vector<8x128xf32>,
    %c0_40 = arith.constant 0 : index
    %c0_41 = arith.constant 0 : index
    %40 = vector.load %arg5[%c0_40, %c0_41] : memref<8x128xf32, #tpu.memory_space<vmem>>, vector<8x128xf32>
    %c0_42 = arith.constant 0 : index
    %c0_43 = arith.constant 0 : index
    %41 = vector.load %arg3[%c0_42, %c0_43] : memref<1x128xf32, #tpu.memory_space<vmem>>, vector<1x128xf32>
    %42 = vector.broadcast %41 : vector<1x128xf32> to vector<8x128xf32>
    %43 = arith.addf %40, %42 : vector<8x128xf32>
    %cst_44 = arith.constant 0.000000e+00 : f32
    %44 = vector.broadcast %cst_44 : f32 to vector<8x128xf32>
    %45 = arith.maximumf %43, %44 : vector<8x128xf32>
    %c0_45 = arith.constant 0 : index
    %c0_46 = arith.constant 0 : index
    %46 = vector.load %arg4[%c0_45, %c0_46] : memref<8x128xf32, #tpu.memory_space<vmem>>, vector<8x128xf32>
    tpu.vector_store %arg4[%c0_45, %c0_46], %45 {strides = array<i32>} : memref<8x128xf32, #tpu.memory_space<vmem>>, vector<8x128xf32>,
    return
  }
  func.func @transform_0(%arg0: i32) -> (i32, i32) {
    %c0_i32 = arith.constant 0 : i32
    %c0_i32_0 = arith.constant 0 : i32
    return %arg0, %c0_i32 : i32, i32
  }
  func.func @transform_1(%arg0: i32) -> (i32, i32) {
    %c0_i32 = arith.constant 0 : i32
    %c0_i32_0 = arith.constant 0 : i32
    %c0_i32_1 = arith.constant 0 : i32
    return %c0_i32, %c0_i32_0 : i32, i32
  }
  func.func @transform_2(%arg0: i32) -> (i32, i32) {
    %c0_i32 = arith.constant 0 : i32
    %c0_i32_0 = arith.constant 0 : i32
    %c0_i32_1 = arith.constant 0 : i32
    return %c0_i32, %c0_i32_0 : i32, i32
  }
  func.func @transform_3(%arg0: i32) -> (i32, i32) {
    %c0_i32 = arith.constant 0 : i32
    %c0_i32_0 = arith.constant 0 : i32
    return %arg0, %c0_i32 : i32, i32
  }
}

</mosaic_0001>

<bundles_post_ra>
// kernel: tpu_custom_call.1
= control target key start
LH: loop header
LB: loop body
LE: loop exit
PB: predicated region body
PF: predicated region fallthrough
CT: control target
= control target key end

     0   :  { %8 = vsyncpa [#allocation4], 0  ;;  %s972_s0 = inlined_call_operand.hbm [shape: bf16[16,192], index: 0, kind: input, shape index: {}]   ;;  %s973_s1 = inlined_call_operand.hbm [shape: bf16[80,128], index: 1, kind: input, shape index: {}]   ;;  %s974_s2 = inlined_call_operand.vmem [shape: f32[1,128], index: 2, kind: input, shape index: {}]   ;;  %s975_s3 = inlined_call_operand.hbm [shape: f32[16,128], index: 3, kind: output, shape index: {}]  }
   0x1   :  { %10 = vsyncpa [#allocation4 + $0x1], 0 }
   0x2   :  { %11 = vsyncpa [#allocation7], 0 }
   0x3   :  { %12 = vsyncpa [#allocation5], 0 }
   0x4   :  { %14 = vsyncpa [#allocation5 + $0x1], 0  ;;  %s816_s12 = smov 0   ;;  %s818_s13 = smov 0  }
   0x5   :  { %s820_s14 = smov 0   ;;  %s822_s15 = smov 0  }
   0x6 LB: > { %s130_s18 = sshll.u32 %s973_s1, 4  ;;  %s840_s19 = sadd.s32 4294967295, %s784_s15   ;;  %s784_s15 = sphi %s822_s15, %s985_s15   ;;  %s780_s14 = sphi %s820_s14, %s984_s14   ;;  %s776_s13 = sphi %s818_s13, %s983_s13   ;;  %s772_s12 = sphi %s816_s12, %s982_s12   ;;  %s131_s18 = int_to_ptr.hbm [resolvable:$true] %s130_s18 }
   0x7   : > { %p539_p0 = scmp.ge.s32.totalorder %s784_s15, 1  ;;  %p41_p1 = scmp.eq.s32.totalorder %s840_s19, 0 }
   0x8   : > { %p119_p2 = scmp.lt.s32.totalorder %s784_s15, 3  ;;  %s786_s21 = smov [#allocation6]  }
   0x9   : > { %s132_s22 = sshll.u32 %s786_s21, 4  ;;  %s787_s23 = smov 64   ;;  %s133_s22 = int_to_ptr.vmem [resolvable:$true] %s132_s22 }
   0xa   : > { %p845_p3 = pnand %p539_p0, %p119_p2  ;;  %s788_s24 = smov 4  }
   0xb   : > { %s538_s25 = sadd.s32 4294967294, %s784_s15   ;;  %s856_s26 = sadd.s32 1, %s784_s15  }
   0xc   : > { %p595_p4 = pneg %p845_p3  ;;  %s27_s27 = sadd.s32 1, %s780_s14 }
   0xd   : > { %s24_s28 = ssub.s32 %s784_s15, %s856_s26  ;;  %p34_p7 = scmp.ne.s32.totalorder %s780_s14, %s776_s13 }
   0xe   : > { %p596_p6 = pnand %p595_p4, %p41_p1  ;;  %p25_p8 = scmp.eq.s32.totalorder %s24_s28, 0 }
   0xf   : > { %p35_p9 = scmp.eq.s32.totalorder %s784_s15, 0  ;;  %p40_p10 = scmp.ne.s32.totalorder %s776_s13, %s772_s12 }
  0x10   : > { %598 = dma.hbm_to_vmem [thread:$0]  (!%p596_p6), %s131_s18, 640, %s133_s22, [#allocation7], %s787_s23, %s787_s23, %s788_s24  }
  0x11   : > { %p106_p11 = scmp.eq.s32.totalorder %s840_s19, 1  ;;  %p872_p12 = por %p41_p1, %p40_p10 }
  0x12   : > { %s868_s29 = scalar_select %p25_p8, %s780_s14, %s27_s27  }
  0x13   : > { %p876_p13 = por %p106_p11, %p34_p7  ;;  %p112_p0 = scmp.eq.s32.totalorder %s538_s25, 1 }
  0x14   : > { %p36_p2 = por %p35_p9, %p34_p7  ;;  %s149_s5 = sand.u32 1, %s780_s14  }
  0x15   : > { %p881_p4 = por %p112_p0, %p40_p10  ;;  %p608_p6 = scmp.lt.s32.totalorder %s784_s15, 2 }
  0x16   : > { %s542_s7 = sshll.u32 %s149_s5, 3  ;;  %s581_s8 = sshll.u32 %s784_s15, 3 }
  0x17   : > { %s158_s11 = scalar_lea.hbm %s972_s0, %s581_s8  ;;  %s153_s17 = scalar_lea.vmem [#allocation3], %s542_s7 }
  0x18   : > { %s160_s16 = sshll.u32 %s158_s11, 4  ;;  %s162_s18 = sshll.u32 %s153_s17, 4  ;;  %s161_s16 = int_to_ptr.hbm [resolvable:$true] %s160_s16  ;;  %s163_s18 = int_to_ptr.vmem [resolvable:$true] %s162_s18 }
  0x19   : > { %p890_p8 = pnand %p608_p6, %p36_p2  ;;  %s150_s22 = scalar_lea.sflag [#allocation4], %s149_s5 }
  0x1a   : > { %s684_s23 = sshra.s32 %s161_s16, 4  ;;  %s691_s28 = scalar_lea.hbm %s972_s0, 16  ;;  %s685_s23 = int_to_ptr.hbm [resolvable:$true] %s684_s23 }
  0x1b   : > { %s686_s24 = scalar_lea.hbm %s685_s23, 8  ;;  %p688_p9 = pneg %p890_p8 }
  0x1c   : > { %p687_p7 = scmp.ne.s32.totalorder %s685_s23, %s686_s24  ;;  %p692_p0 = scmp.lt.s32.totalorder %s685_s23, %s972_s0 }
  0x1d   : > { %p693_p2 = scmp.lt.s32.totalorder %s691_s28, %s686_s24 }
  0x1e   : > { %p689_p10 = pnand %p688_p9, %p687_p7 }
  0x1f   : > { %p694_p6 = por %p693_p2, %p692_p0 }
  0x20   : > { %p690_p11 = pneg %p689_p10 }
  0x22   : > { %p695_p5 = pnand %p694_p6, %p690_p11 }
  0x24   : > { %698 = shalt.err (!%p695_p5)
}
  0x25   : > { %602 = dma.hbm_to_vmem [thread:$0]  (!%p890_p8), %s161_s16, 128, %s163_s18, %s150_s22  }
  0x26   : > { %171 = sbr.rel (%p845_p3) target bundleno = 332 (0x14c), region = 32  ;;  %s907_s5 = sand.u32 (!%p845_p3), 1, %s776_s13  }
  0x27   : > { %s546_s9 = sshll.u32 (!%p845_p3), %s907_s5, 3  ;;  %s174_s10 = scalar_lea.sflag (!%p845_p3), [#allocation4], %s907_s5 }
  0x28   : > { %s177_s11 = scalar_lea.vmem (!%p845_p3), [#allocation3], %s546_s9 }
  0x2b   : > { %759 = dma.done.wait (%p872_p12), %s174_s10, 128  }
  0x2c   : > { %761 = vsyncadd (%p872_p12), %s174_s10, 4294967168 }
  0x2d   : > { %763 = dma.done.wait (%p41_p1), [#allocation7], 640  }
  0x2e   : > { %765 = vsyncadd (%p41_p1), [#allocation7], 4294966656  ;;  %v921_v0 = vld [vmem:[%s177_s11] sm:$0xff]  ;;  %v586_v1 = vld [vmem:[#allocation6 + $0x20] sm:$0xff]  ;;  %s789_s20 = smov 112   ;;  %s790_s30 = smov 96  }
  0x2f   : > { %v268_v2 = vunpack.c.l.b16 %v921_v0  ;;  %v333_v3 = vunpack.c.h.b16 %v921_v0  ;;  %299 = vmatpush.bf16.msra.mxu2 %v586_v1  ;;  %255 = vmatpush.bf16.msra.mxu0 %v586_v1  ;;  %v585_v4 = vld [vmem:[#allocation6 + $0x18] sm:$0xff]  ;;  %s791_s16 = smov 32   ;;  %v584_v7 = vld [vmem:[#allocation6 + $0x10] sm:$0xff]  ;;  %v583_v8 = vld [vmem:[#allocation6 + $0x8] sm:$0xff]  ;;  %s792_s17 = smov 80   ;;  %vm248_vm0 = vcmask 654336  }
  0x30   : > { %278 = vmatpush.bf16.msra.mxu1 %v586_v1  ;;  %320 = vmatpush.bf16.msra.mxu3 %v586_v1  ;;  %s793_s18 = smov 64   ;;  %v582_v9 = vld [vmem:[#allocation6] sm:$0xff]  ;;  %s794_s21 = smov 16   ;;  %vm389_vm1 = vcmask 261120   ;;  %vm339_vm2 = vcmask 523264   ;;  %vm414_vm3 = vcmask 130048  }
  0x31   : > { %v269_v5 = vpack.c.b16 %v268_v2, %v268_v2  ;;  %v334_v6 = vpack.c.b16 %v333_v3, %v333_v3  ;;  %s795_s22 = smov 48   ;;  %vm364_vm4 = vcmask 392192   ;;  %s578_s23 = sshll.u32 %s840_s19, 3  ;;  %v653_v43 = vld [vmem:[%s974_s2] ss:$0 sm:$0xff] }
  0x32   : > { %s453_s7 = scalar_lea.hbm %s975_s3, %s578_s23  ;;  %s205_s8 = scalar_lea.vmem [#allocation8], %s546_s9 }
  0x33   : > { %270 = vrot.lane.b32.xlu1 %v269_v5, %s789_s20  ;;  %291 = vrot.lane.b32.xlu0 %v269_v5, %s790_s30  ;;  %s455_s10 = sshll.u32 %s205_s8, 4  ;;  %s457_s11 = sshll.u32 %s453_s7, 4  ;;  %s456_s10 = int_to_ptr.vmem [resolvable:$true] %s455_s10  ;;  %s458_s11 = int_to_ptr.hbm [resolvable:$true] %s457_s11 }
  0x34   : > { %387 = vrot.lane.b32.xlu2 %v334_v6, %s791_s16  ;;  %300 = vmatpush.bf16.msra.mxu2 %v585_v4  ;;  %s443_s19 = scalar_lea.sflag [#allocation5], %s907_s5  ;;  %s728_s20 = sshra.s32 %s458_s11, 4  ;;  %s729_s20 = int_to_ptr.hbm [resolvable:$true] %s728_s20 }
  0x35   : > { %256 = vmatpush.bf16.msra.mxu0 %v585_v4  ;;  %279 = vmatpush.bf16.msra.mxu1 %v585_v4  ;;  %s730_s30 = scalar_lea.hbm %s729_s20, 8  ;;  %s734_s9 = scalar_lea.hbm %s975_s3, 16 }
  0x36   : > { %321 = vmatpush.bf16.msra.mxu3 %v585_v4  ;;  %p731_p1 = scmp.ne.s32.totalorder %s729_s20, %s730_s30  ;;  %p735_p12 = scmp.lt.s32.totalorder %s729_s20, %s975_s3 }
  0x37   : > { %p736_p8 = scmp.lt.s32.totalorder %s734_s9, %s730_s30 }
  0x38   : > { %301 = vmatpush.bf16.msra.mxu2 %v584_v7  ;;  %p732_p3 = pnand %p731_p1, %p876_p13 }
  0x39   : > { %257 = vmatpush.bf16.msra.mxu0 %v584_v7  ;;  %280 = vmatpush.bf16.msra.mxu1 %v584_v7  ;;  %p737_p7 = por %p736_p8, %p735_p12 }
  0x3a   : > { %322 = vmatpush.bf16.msra.mxu3 %v584_v7  ;;  %p733_p5 = pneg %p732_p3 }
  0x3b   : > { %385 = vrot.lane.b32.xlu1 %v269_v5, %s791_s16  ;;  %312 = vrot.lane.b32.xlu0 %v269_v5, %s792_s17 }
  0x3c   : > { %335 = vrot.lane.b32.xlu2 %v269_v5, %s793_s18  ;;  %302 = vmatpush.bf16.msra.mxu2 %v583_v8  ;;  %p738_p9 = pnand %p737_p7, %p733_p5 }
  0x3d   : > { %258 = vmatpush.bf16.msra.mxu0 %v583_v8  ;;  %281 = vmatpush.bf16.msra.mxu1 %v583_v8 }
  0x3e   : > { %323 = vmatpush.bf16.msra.mxu3 %v583_v8 }
  0x40   : > { %303 = vmatpush.bf16.msra.mxu2 %v582_v9 }
  0x41   : > { %259 = vmatpush.bf16.msra.mxu0 %v582_v9  ;;  %282 = vmatpush.bf16.msra.mxu1 %v582_v9 }
  0x42   : > { %324 = vmatpush.bf16.msra.mxu3 %v582_v9 }
  0x43   : > { %410 = vrot.lane.b32.xlu1 %v269_v5, %s794_s21  ;;  %337 = vrot.lane.b32.xlu0 %v334_v6, %s793_s18 }
  0x44   : > { %397 = vmatpush.bf16.msrb.mxu2 %v586_v1  ;;  %412 = vrot.lane.b32.xlu2 %v334_v6, %s794_s21 }
  0x45   : > { %347 = vmatpush.bf16.msrb.mxu0 %v586_v1  ;;  %372 = vmatpush.bf16.msrb.mxu1 %v586_v1 }
  0x46   : > { %422 = vmatpush.bf16.msrb.mxu3 %v586_v1  ;;  %569 = vmatmul.msk.bf16.vlgmr.msra.gmra.mxu0 %vm248_vm0, %v921_v0 }
  0x48   : > { %398 = vmatpush.bf16.msrb.mxu2 %v585_v4 }
  0x49   : > { %348 = vmatpush.bf16.msrb.mxu0 %v585_v4  ;;  %373 = vmatpush.bf16.msrb.mxu1 %v585_v4 }
  0x4a   : > { %423 = vmatpush.bf16.msrb.mxu3 %v585_v4 }
  0x4b   : > { %362 = vrot.lane.b32.xlu1 %v334_v6, %s795_s22  ;;  %360 = vrot.lane.b32.xlu0 %v269_v5, %s795_s22 }
  0x4c   : > { %399 = vmatpush.bf16.msrb.mxu2 %v584_v7 }
  0x4d   : > { %349 = vmatpush.bf16.msrb.mxu0 %v584_v7  ;;  %374 = vmatpush.bf16.msrb.mxu1 %v584_v7 }
  0x4e   : > { %424 = vmatpush.bf16.msrb.mxu3 %v584_v7 }
  0x50   : > { %400 = vmatpush.bf16.msrb.mxu2 %v583_v8 }
  0x51   : > { %350 = vmatpush.bf16.msrb.mxu0 %v583_v8  ;;  %375 = vmatpush.bf16.msrb.mxu1 %v583_v8 }
  0x52   : > { %425 = vmatpush.bf16.msrb.mxu3 %v583_v8 }
  0x54   : > { %401 = vmatpush.bf16.msrb.mxu2 %v582_v9 }
  0x55   : > { %351 = vmatpush.bf16.msrb.mxu0 %v582_v9  ;;  %376 = vmatpush.bf16.msrb.mxu1 %v582_v9 }
  0x56   : > { %426 = vmatpush.bf16.msrb.mxu3 %v582_v9 }
  0x8e   : > { %v388_v12 = vpop.permute.xlu2 %387 }
  0x96   : > { %v336_v15 = vpop.permute.xlu2 %335 }
  0x9e   : > { %v413_v20 = vpop.permute.xlu2 %412 }
  0xa5   : > { %v271_v10 = vpop.permute.xlu1 %270  ;;  %v292_v11 = vpop.permute.xlu0 %291 }
  0xa6   : > { %570 = vmatmul.msk.bf16.vlgmr.msra.gmra.mxu1 %vm248_vm0, %v271_v10  ;;  %571 = vmatmul.msk.bf16.vlgmr.msra.gmra.mxu2 %vm248_vm0, %v292_v11 }
  0xad   : > { %v386_v13 = vpop.permute.xlu1 %385  ;;  %v313_v14 = vpop.permute.xlu0 %312 }
  0xae   : > { %572 = vmatmul.msk.bf16.vlgmr.msra.gmra.mxu3 %vm248_vm0, %v313_v14  ;;  %v390_v16 = vsel %vm389_vm1, %v386_v13, %v388_v12 }
  0xb5   : > { %v411_v17 = vpop.permute.xlu1 %410  ;;  %v338_v18 = vpop.permute.xlu0 %337 }
  0xb6   : > { %v340_v19 = vsel %vm339_vm2, %v336_v15, %v338_v18  ;;  %575 = vmatmul.msk.bf16.vlgmr.msrb.gmra.mxu2 %vm248_vm0, %v390_v16  ;;  %v415_v21 = vsel %vm414_vm3, %v411_v17, %v413_v20 }
  0xb7   : > { %573 = vmatmul.msk.bf16.vlgmr.msrb.gmra.mxu0 %vm248_vm0, %v340_v19 }
  0xbd   : > { %v363_v22 = vpop.permute.xlu1 %362  ;;  %v361_v23 = vpop.permute.xlu0 %360 }
  0xbe   : > { %v365_v24 = vsel %vm364_vm4, %v361_v23, %v363_v22  ;;  %576 = vmatmul.msk.bf16.vlgmr.msrb.gmra.mxu3 %vm248_vm0, %v415_v21 }
  0xbf   : > { %574 = vmatmul.msk.bf16.vlgmr.msrb.gmra.mxu1 %vm248_vm0, %v365_v24 }
  0xc3   : > { %v261_v25 = vpop.f32.mrf.mxu0 }
  0xcb   : > { %v263_v26 = vpop.f32.mrf.mxu0 }
 0x123   : > { %v284_v27 = vpop.f32.mrf.mxu1 }
 0x124   : > { %v288_v32 = vmax.f32 %v261_v25, %v284_v27 }
 0x129   : > { %v305_v28 = vpop.f32.mrf.mxu2 }
 0x12a   : > { %v309_v34 = vmax.f32 %v288_v32, %v305_v28 }
 0x12b   : > { %v286_v29 = vpop.f32.mrf.mxu1 }
 0x131   : > { %v307_v30 = vpop.f32.mrf.mxu2  ;;  %v326_v31 = vpop.f32.mrf.mxu3 }
 0x132   : > { %v330_v35 = vmax.f32 %v309_v34, %v326_v31 }
 0x134   : > { %v353_v33 = vpop.f32.mrf.mxu0 }
 0x135   : > { %v357_v38 = vmax.f32 %v330_v35, %v353_v33 }
 0x139   : > { %v328_v36 = vpop.f32.mrf.mxu3  ;;  %v403_v37 = vpop.f32.mrf.mxu2 }
 0x13c   : > { %v355_v39 = vpop.f32.mrf.mxu0  ;;  %v378_v40 = vpop.f32.mrf.mxu1 }
 0x13d   : > { %v382_v41 = vmax.f32 %v357_v38, %v378_v40 }
 0x13f   : > { %v407_v42 = vmax.f32 %v382_v41, %v403_v37 }
 0x141   : > { %v405_v44 = vpop.f32.mrf.mxu2  ;;  %v428_v45 = vpop.f32.mrf.mxu3 }
 0x142   : > { %v432_v46 = vmax.f32 %v407_v42, %v428_v45 }
 0x144   : > { %v439_v47 = vadd.f32 %v653_v43, %v432_v46  ;;  %v380_v48 = vpop.f32.mrf.mxu1 }
 0x146   : > { %v440_v49 = vmax.f32 %v439_v47, 0.0 }
 0x148   : > { %441 = vst [vmem:[%s205_s8] sm:$0xff] %v440_v49 }
 0x149   : > { %v430_v50 = vpop.f32.mrf.mxu3 }
 0x14a   : > { %741 = shalt.err (!%p738_p9)
}
 0x14b   : > { %593 = dma.vmem_to_hbm [thread:$0]  (%p876_p13), %s456_s10, 128, %s458_s11, %s443_s19  }
 0x14c PF: > { %s469_s5 = sand.u32 1, %s772_s12   ;;  %p981_p10 = scmp.ge.s32.totalorder %s784_s15, 2 }
 0x14d   : > { %s470_s22 = scalar_lea.sflag [#allocation5], %s469_s5 }
 0x14e   : > { %p604_p11 = pnand %p981_p10, %p881_p4 }
 0x150   : > { %p605_p0 = pneg %p604_p11 }
 0x152   : > { %767 = dma.done.wait (%p605_p0), %s470_s22, 128  }
 0x153   : > { %769 = vsyncadd (%p605_p0), %s470_s22, 4294967168  ;;  %p17_p2 = scmp.ge.s32.totalorder %s856_s26, 4   ;;  %s982_s12 = smov %s776_s13 }
 0x154   : > { %s983_s13 = smov %s780_s14  ;;  %s984_s14 = smov %s868_s29 }
 0x155   : > { %s985_s15 = smov %s856_s26  ;;  %19 = sbr.rel (!%p17_p2) target bundleno = 6 (0x6), region = 81 }
 0x15a   :  { %476 = vsyncpa [#allocation4], 1 }
 0x15b   :  { %478 = vsyncpa [#allocation4 + $0x1], 1 }
 0x15c   :  { %479 = vsyncpa [#allocation7], 1 }
 0x15d   :  { %480 = vsyncpa [#allocation5], 1 }
 0x15e   :  { %482 = vsyncpa [#allocation5 + $0x1], 1 }

</bundles_post_ra>
